<compile_context>
chip_gen: v7x
topology: tpu7x:2x2x1
jax: 0.10.0
libtpu: 0.0.40
codegen_flags: <defaults>
</compile_context>

<pallas_src>
import functools

import jax
import jax.numpy as jnp
from jax.experimental import pallas as pl
from jax.experimental.pallas import tpu as pltpu

IN_DIM = 32
HID_DIM = 64
OUT_DIM = 784


def generator_kernel(x_ref, w1_ref, b1_ref, w2_ref, b2_ref, o_ref):
    # Layer 1: (TB, 32) @ (32, 64) on the MXU, f32 accumulation.
    h = jnp.dot(x_ref[...], w1_ref[...], preferred_element_type=jnp.float32)
    h = h + b1_ref[...]                       # broadcast (1, 64) over batch
    # LeakyReLU(0.2)
    h = jnp.where(h > 0, h, 0.2 * h)
    # Layer 2: (TB, 64) @ (64, 784) on the MXU.
    y = jnp.dot(h, w2_ref[...], preferred_element_type=jnp.float32)
    y = y + b2_ref[...]                       # broadcast (1, 784) over batch
    # tanh output nonlinearity (EUP); hidden under the output DMA.
    o_ref[...] = jnp.tanh(y).astype(o_ref.dtype)


def _choose_batch_tile(B, tb):
    """Pick a batch tile that avoids padding/slicing whenever possible."""
    if B <= tb:
        # One block covering the whole batch dim (legal for any B, since the
        # block dim equals the full array dim). No padding, grid=(1,).
        return B
    # Largest multiple of 8 (sublane granule) <= tb that divides B exactly.
    start = (tb // 8) * 8
    for cand in range(start, 0, -8):
        if B % cand == 0:
            return cand
    # Ragged batch with no nice divisor: fall back to padding + final slice.
    return start


@functools.partial(
    jax.jit, static_argnames=("tb", "core_parallel", "out_dtype"))
def generator_forward(x, w1, b1, w2, b2, *, tb=1024, core_parallel=False,
                      out_dtype=jnp.float32):
    B, in_dim = x.shape
    out_dim = w2.shape[1]

    TB = _choose_batch_tile(B, tb)
    Bp = ((B + TB - 1) // TB) * TB            # == B except ragged fallback
    xp = jnp.pad(x, ((0, Bp - B), (0, 0))) if Bp != B else x

    batch_sem = pltpu.CORE_PARALLEL if core_parallel else "parallel"

    out = pl.pallas_call(
        generator_kernel,
        out_shape=jax.ShapeDtypeStruct((Bp, out_dim), out_dtype),
        grid=(Bp // TB,),
        in_specs=[
            pl.BlockSpec((TB, in_dim), lambda i: (i, 0)),   # batch-tiled input
            pl.BlockSpec(w1.shape, lambda i: (0, 0)),       # VMEM-resident
            pl.BlockSpec(b1.shape, lambda i: (0, 0)),
            pl.BlockSpec(w2.shape, lambda i: (0, 0)),
            pl.BlockSpec(b2.shape, lambda i: (0, 0)),
        ],
        out_specs=pl.BlockSpec((TB, out_dim), lambda i: (i, 0)),
        compiler_params=pltpu.CompilerParams(
            dimension_semantics=(batch_sem,),
        ),
    )(xp, w1, b1, w2, b2)

    # Identity in the common case (Bp == B); only the ragged fallback slices.
    return out if Bp == B else out[:B]


def init_params(key):
    """Deterministic parameter init matching the PyTorch module's shapes."""
    k1, k2, k3, k4 = jax.random.split(key, 4)
    # Stored as (in_features, out_features) == PyTorch weight transposed.
    w1 = jax.random.normal(k1, (IN_DIM, HID_DIM), jnp.float32) * 0.1
    b1 = jax.random.normal(k2, (1, HID_DIM), jnp.float32) * 0.1
    w2 = jax.random.normal(k3, (HID_DIM, OUT_DIM), jnp.float32) * 0.1
    b2 = jax.random.normal(k4, (1, OUT_DIM), jnp.float32) * 0.1
    return w1, b1, w2, b2


def reference_forward(x, w1, b1, w2, b2):
    h = x @ w1 + b1
    h = jnp.where(h > 0, h, 0.2 * h)
    y = h @ w2 + b2
    return jnp.tanh(y)


if __name__ == "__main__":
    key = jax.random.PRNGKey(0)
    kx, kp = jax.random.split(key)

    B = 8  # small batch
    x = jax.random.normal(kx, (B, IN_DIM), jnp.float32)
    w1, b1, w2, b2 = init_params(kp)

    out = generator_forward(x, w1, b1, w2, b2)
    out = jax.block_until_ready(out)

    ref = reference_forward(x, w1, b1, w2, b2)
    assert out.shape == (B, OUT_DIM), out.shape
    assert jnp.allclose(out, ref, atol=1e-5, rtol=1e-5), "mismatch vs reference"

    print("KERNEL_OK")
</pallas_src>

<mosaic_0001>
module attributes {stable_mosaic.version = 11 : i64} {
  func.func @generator_kernel(%arg0: i32, %arg1: memref<8x32xf32, #tpu.memory_space<vmem>>, %arg2: memref<32x64xf32, #tpu.memory_space<vmem>>, %arg3: memref<1x64xf32, #tpu.memory_space<vmem>>, %arg4: memref<64x784xf32, #tpu.memory_space<vmem>>, %arg5: memref<1x784xf32, #tpu.memory_space<vmem>>, %arg6: memref<8x784xf32, #tpu.memory_space<vmem>>) attributes {dimension_semantics = [#tpu.dimension_semantics<parallel>], iteration_bounds = array<i64: 1>, scalar_prefetch = 0 : i64, scratch_operands = 0 : i64, tpu.core_type = #tpu.core_type<tc>, window_params = [{transform_indices = @transform_0, window_bounds = array<i64: 8, 32>}, {pipeline_mode = #tpu.pipeline_mode<synchronous>, transform_indices = @transform_1, window_bounds = array<i64: 32, 64>}, {pipeline_mode = #tpu.pipeline_mode<synchronous>, transform_indices = @transform_2, window_bounds = array<i64: 1, 64>}, {pipeline_mode = #tpu.pipeline_mode<synchronous>, transform_indices = @transform_3, window_bounds = array<i64: 64, 784>}, {pipeline_mode = #tpu.pipeline_mode<synchronous>, transform_indices = @transform_4, window_bounds = array<i64: 1, 784>}, {transform_indices = @transform_5, window_bounds = array<i64: 8, 784>}]} {
    %c0 = arith.constant 0 : index
    %c0_0 = arith.constant 0 : index
    %0 = vector.load %arg1[%c0, %c0_0] : memref<8x32xf32, #tpu.memory_space<vmem>>, vector<8x32xf32>
    %c0_1 = arith.constant 0 : index
    %c0_2 = arith.constant 0 : index
    %1 = vector.load %arg2[%c0_1, %c0_2] : memref<32x64xf32, #tpu.memory_space<vmem>>, vector<32x64xf32>
    %cst = arith.constant dense<0.000000e+00> : vector<8x64xf32>
    %2 = tpu.matmul %0, %1, %cst {dimension_numbers = #tpu.dot_dimension_numbers<[1], [0], [0], [1], [0, 0, 1, 1], [], []>} : vector<8x32xf32>, vector<32x64xf32>, vector<8x64xf32> -> vector<8x64xf32>
    %c0_3 = arith.constant 0 : index
    %c0_4 = arith.constant 0 : index
    %3 = vector.load %arg3[%c0_3, %c0_4] : memref<1x64xf32, #tpu.memory_space<vmem>>, vector<1x64xf32>
    %4 = vector.broadcast %3 : vector<1x64xf32> to vector<8x64xf32>
    %5 = arith.addf %2, %4 : vector<8x64xf32>
    %cst_5 = arith.constant 0.000000e+00 : f32
    %6 = vector.broadcast %cst_5 : f32 to vector<8x64xf32>
    %7 = arith.cmpf ogt, %5, %6 : vector<8x64xf32>
    %cst_6 = arith.constant 2.000000e-01 : f32
    %8 = vector.broadcast %cst_6 : f32 to vector<8x64xf32>
    %9 = arith.mulf %8, %5 : vector<8x64xf32>
    %10 = arith.select %7, %5, %9 : vector<8x64xi1>, vector<8x64xf32>
    %c0_7 = arith.constant 0 : index
    %c0_8 = arith.constant 0 : index
    %11 = vector.load %arg4[%c0_7, %c0_8] : memref<64x784xf32, #tpu.memory_space<vmem>>, vector<64x784xf32>
    %cst_9 = arith.constant dense<0.000000e+00> : vector<8x784xf32>
    %12 = tpu.matmul %10, %11, %cst_9 {dimension_numbers = #tpu.dot_dimension_numbers<[1], [0], [0], [1], [0, 0, 1, 1], [], []>} : vector<8x64xf32>, vector<64x784xf32>, vector<8x784xf32> -> vector<8x784xf32>
    %c0_10 = arith.constant 0 : index
    %c0_11 = arith.constant 0 : index
    %13 = vector.load %arg5[%c0_10, %c0_11] : memref<1x784xf32, #tpu.memory_space<vmem>>, vector<1x784xf32>
    %14 = vector.broadcast %13 : vector<1x784xf32> to vector<8x784xf32>
    %15 = arith.addf %12, %14 : vector<8x784xf32>
    %16 = math.tanh %15 : vector<8x784xf32>
    %c0_12 = arith.constant 0 : index
    %c0_13 = arith.constant 0 : index
    %17 = vector.load %arg6[%c0_12, %c0_13] : memref<8x784xf32, #tpu.memory_space<vmem>>, vector<8x784xf32>
    tpu.vector_store %arg6[%c0_12, %c0_13], %16 {strides = array<i32>} : memref<8x784xf32, #tpu.memory_space<vmem>>, vector<8x784xf32>,
    return
  }
  func.func @transform_0(%arg0: i32) -> (i32, i32) {
    %c0_i32 = arith.constant 0 : i32
    %c0_i32_0 = arith.constant 0 : i32
    return %arg0, %c0_i32 : i32, i32
  }
  func.func @transform_1(%arg0: i32) -> (i32, i32) {
    %c0_i32 = arith.constant 0 : i32
    %c0_i32_0 = arith.constant 0 : i32
    %c0_i32_1 = arith.constant 0 : i32
    return %c0_i32, %c0_i32_0 : i32, i32
  }
  func.func @transform_2(%arg0: i32) -> (i32, i32) {
    %c0_i32 = arith.constant 0 : i32
    %c0_i32_0 = arith.constant 0 : i32
    %c0_i32_1 = arith.constant 0 : i32
    return %c0_i32, %c0_i32_0 : i32, i32
  }
  func.func @transform_3(%arg0: i32) -> (i32, i32) {
    %c0_i32 = arith.constant 0 : i32
    %c0_i32_0 = arith.constant 0 : i32
    %c0_i32_1 = arith.constant 0 : i32
    return %c0_i32, %c0_i32_0 : i32, i32
  }
  func.func @transform_4(%arg0: i32) -> (i32, i32) {
    %c0_i32 = arith.constant 0 : i32
    %c0_i32_0 = arith.constant 0 : i32
    %c0_i32_1 = arith.constant 0 : i32
    return %c0_i32, %c0_i32_0 : i32, i32
  }
  func.func @transform_5(%arg0: i32) -> (i32, i32) {
    %c0_i32 = arith.constant 0 : i32
    %c0_i32_0 = arith.constant 0 : i32
    return %arg0, %c0_i32 : i32, i32
  }
}

</mosaic_0001>

<bundles_post_ra>
// kernel: generator_forward.1
= control target key start
LH: loop header
LB: loop body
LE: loop exit
PB: predicated region body
PF: predicated region fallthrough
CT: control target
= control target key end

     0   :  { %10 = vsyncpa [#allocation3], 0  ;;  %s907_s0 = inlined_call_operand.hbm [shape: f32[8,32], index: 0, kind: input, shape index: {}]   ;;  %s908_s1 = inlined_call_operand.hbm [shape: f32[32,64], index: 1, kind: input, shape index: {}]   ;;  %s909_s2 = inlined_call_operand.vmem [shape: f32[1,64], index: 2, kind: input, shape index: {}]   ;;  %s910_s3 = inlined_call_operand.hbm [shape: f32[64,784], index: 3, kind: input, shape index: {}]   ;;  %s911_s4 = inlined_call_operand.vmem [shape: f32[1,784], index: 4, kind: input, shape index: {}]   ;;  %s912_s5 = inlined_call_operand.hbm [shape: f32[8,784], index: 5, kind: output, shape index: {}]  }
   0x1   :  { %11 = vsyncpa [#allocation6], 0 }
   0x2   :  { %12 = vsyncpa [#allocation4], 0  ;;  %s795_s18 = smov [#allocation5]   ;;  %s701_s22 = scalar_lea.hbm %s908_s1, 512 }
   0x3   :  { %s28_s19 = sshll.u32 %s795_s18, 4  ;;  %p702_p0 = scmp.ne.s32.totalorder %s908_s1, %s701_s22  ;;  %s29_s19 = int_to_ptr.vmem [resolvable:$true] %s28_s19 }
   0x4   :  { %p705_p1 = scmp.lt.u32.totalorder %s701_s22, %s908_s1 }
   0x6   :  { %p707_p2 = pnand %p705_p1, %p702_p0 }
   0x8   :  { %710 = shalt.err (!%p707_p2)
}
   0x9   :  { %s711_s27 = scalar_lea.vmem %s29_s19, 512  ;;  %p716_p4 = scmp.lt.s32.totalorder %s29_s19, %s29_s19 }
   0xa   :  { %p712_p3 = scmp.ne.s32.totalorder %s29_s19, %s711_s27  ;;  %p717_p5 = scmp.lt.s32.totalorder %s711_s27, %s711_s27 }
   0xc   :  { %p718_p6 = por %p717_p5, %p716_p4 }
   0xe   :  { %p719_p7 = pnand %p718_p6, %p712_p3 }
  0x10   :  { %722 = shalt.err (!%p719_p7)
}
  0x11   :  { %s796_s28 = smov 128   ;;  %s797_s29 = smov 8  }
  0x12   :  { %34 = dma.hbm_to_vmem [thread:$0]  %s908_s1, 512, %s29_s19, [#allocation6], %s796_s28, %s796_s28, %s797_s29  }
  0x13   :  { %s798_s7 = smov [#allocation2]   ;;  %s799_s9 = smov [#allocation7]  }
  0x14   :  { %s19_s8 = sshll.u32 %s798_s7, 4  ;;  %s42_s10 = sshll.u32 %s799_s9, 4  ;;  %s20_s8 = int_to_ptr.vmem [resolvable:$true] %s19_s8  ;;  %s43_s10 = int_to_ptr.vmem [resolvable:$true] %s42_s10 }
  0x15   :  { %s723_s13 = scalar_lea.hbm %s907_s0, 128 }
  0x16   :  { %p724_p8 = scmp.ne.s32.totalorder %s907_s0, %s723_s13  ;;  %p727_p9 = scmp.lt.u32.totalorder %s723_s13, %s907_s0 }
  0x18   :  { %p729_p10 = pnand %p727_p9, %p724_p8 }
  0x1a   :  { %732 = shalt.err (!%p729_p10)
}
  0x1b   :  { %s733_s1 = scalar_lea.vmem %s20_s8, 128  ;;  %p738_p12 = scmp.lt.s32.totalorder %s20_s8, %s20_s8 }
  0x1c   :  { %p734_p11 = scmp.ne.s32.totalorder %s20_s8, %s733_s1  ;;  %p739_p13 = scmp.lt.s32.totalorder %s733_s1, %s733_s1 }
  0x1e   :  { %p740_p0 = por %p739_p13, %p738_p12 }
  0x20   :  { %p741_p1 = pnand %p740_p0, %p734_p11 }
  0x22   :  { %744 = shalt.err (!%p741_p1)
}
  0x23   :  { %22 = dma.hbm_to_vmem [thread:$0]  %s907_s0, 128, %s20_s8, [#allocation3]  }
  0x24   :  { %s745_s22 = scalar_lea.hbm %s910_s3, 7168 }
  0x25   :  { %p746_p2 = scmp.ne.s32.totalorder %s910_s3, %s745_s22  ;;  %p749_p3 = scmp.lt.u32.totalorder %s745_s22, %s910_s3 }
  0x27   :  { %p751_p4 = pnand %p749_p3, %p746_p2 }
  0x29   :  { %754 = shalt.err (!%p751_p4)
}
  0x2a   :  { %s755_s27 = scalar_lea.vmem %s43_s10, 7168  ;;  %p760_p6 = scmp.lt.s32.totalorder %s43_s10, %s43_s10 }
  0x2b   :  { %p756_p5 = scmp.ne.s32.totalorder %s43_s10, %s755_s27  ;;  %p761_p7 = scmp.lt.s32.totalorder %s755_s27, %s755_s27 }
  0x2d   :  { %p762_p8 = por %p761_p7, %p760_p6 }
  0x2f   :  { %p763_p9 = pnand %p762_p8, %p756_p5 }
  0x31   :  { %766 = shalt.err (!%p763_p9)
}
  0x32   :  { %s800_s0 = smov 896   ;;  %s801_s28 = smov 56  }
  0x33   :  { %48 = dma.hbm_to_vmem [thread:$0]  %s910_s3, 7168, %s43_s10, [#allocation6], %s800_s0, %s800_s0, %s801_s28  }
  0x34   :  { %789 = dma.done.wait [#allocation3], 128  }
  0x35   :  { %790 = vsyncadd [#allocation3], 4294967168 }
  0x36   :  { %791 = dma.done.wait [#allocation6], 7680  }
  0x37   :  { %792 = vsyncadd [#allocation6], 4294959616  ;;  %v802_v0 = vmov 0.0|0.0   ;;  %vm803_vm0 = vmmov 0   ;;  %v804_v1 = vmov 0.0   ;;  %v61_v2 = vld [vmem:[#allocation5] sm:$0xff] }
  0x38   :  { %610 = vmatprep.subr.bf16.mxu0 %v802_v0  ;;  %588 = vmatprep.mubr.msk.f32.mxu0 %vm803_vm0, %v804_v1  ;;  %v62_v3 = vld [vmem:[#allocation5 + $0x8] sm:$0xff]  ;;  %v63_v4 = vld [vmem:[#allocation5 + $0x10] sm:$0xff]  ;;  %v64_v6 = vld [vmem:[#allocation5 + $0x18] sm:$0xff]  ;;  %vm72_vm1 = vcmask 261120   ;;  %vm242_vm3 = vcmask 523264   ;;  %vm542_vm4 = vcmask 130048  }
  0x39   :  { %310 = vmatprep.mubr.f32.mxu1 %v804_v1  ;;  %v611_v5 = vpack.c.bf16 %v62_v3, %v61_v2  ;;  %v150_v7 = vld [vmem:[#allocation7 + $0x8] sm:$0xff]  ;;  %v157_v8 = vld [vmem:[#allocation7 + $0x40] sm:$0xff]  ;;  %v152_v9 = vld [vmem:[#allocation7 + $0x18] sm:$0xff]  ;;  %v614_v11 = vpack.c.bf16 %v64_v6, %v63_v4 }
  0x3a   :  { %v159_v10 = vld [vmem:[#allocation7 + $0x50] sm:$0xff]  ;;  %v616_v12 = vpack.c.bf16 %v157_v8, %v150_v7  ;;  %v149_v13 = vld [vmem:[#allocation7] sm:$0xff]  ;;  %v156_v14 = vld [vmem:[#allocation7 + $0x38] sm:$0xff] }
  0x3b   :  { %612 = vmatpush3.bf16.msra.mxu0 %v611_v5  ;;  %v151_v15 = vld [vmem:[#allocation7 + $0x10] sm:$0xff]  ;;  %v632_v16 = vpack.c.bf16 %v159_v10, %v152_v9  ;;  %v618_v17 = vpack.c.bf16 %v156_v14, %v149_v13  ;;  %v158_v18 = vld [vmem:[#allocation7 + $0x48] sm:$0xff]  ;;  %v164_v19 = vld [vmem:[#allocation7 + $0x78] sm:$0xff] }
  0x3c   :  { %613 = vmatprep.subr.bf16.mxu0 %v802_v0  ;;  %v171_v20 = vld [vmem:[#allocation7 + $0xb0] sm:$0xff]  ;;  %617 = vmatprep.subr.bf16.mxu1 %v616_v12  ;;  %v166_v22 = vld [vmem:[#allocation7 + $0x88] sm:$0xff]  ;;  %v173_v23 = vld [vmem:[#allocation7 + $0xc0] sm:$0xff]  ;;  %v634_v27 = vpack.c.bf16 %v158_v18, %v151_v15 }
  0x3d   :  { %v620_v21 = vpack.c.bf16 %v171_v20, %v164_v19  ;;  %v163_v24 = vld [vmem:[#allocation7 + $0x70] sm:$0xff]  ;;  %v60_v25 = vld [vmem:[#allocation2] sm:$0xff]  ;;  %619 = vmatpush1.bf16.msra.mxu1 %v618_v17  ;;  %v170_v26 = vld [vmem:[#allocation7 + $0xa8] sm:$0xff]  ;;  %v636_v32 = vpack.c.bf16 %v173_v23, %v166_v22 }
  0x3e   :  { %v622_v28 = vpack.c.bf16 %v170_v26, %v163_v24  ;;  %v165_v29 = vld [vmem:[#allocation7 + $0x80] sm:$0xff]  ;;  %v178_v30 = vld [vmem:[#allocation7 + $0xe8] sm:$0xff]  ;;  %v172_v33 = vld [vmem:[#allocation7 + $0xb8] sm:$0xff] }
  0x3f   :  { %615 = vmatpush3.bf16.msra.mxu0 %v614_v11  ;;  %621 = vmatprep.subr.bf16.mxu1 %v620_v21  ;;  %v185_v31 = vld [vmem:[#allocation7 + $0x120] sm:$0xff]  ;;  %v184_v36 = vld [vmem:[#allocation7 + $0x118] sm:$0xff]  ;;  %v187_v38 = vld [vmem:[#allocation7 + $0x130] sm:$0xff]  ;;  %v638_v40 = vpack.c.bf16 %v172_v33, %v165_v29 }
  0x40   :  { %633 = vmatprep.subr.bf16.mxu0 %v632_v16  ;;  %v624_v34 = vpack.c.bf16 %v185_v31, %v178_v30  ;;  %v177_v35 = vld [vmem:[#allocation7 + $0xe0] sm:$0xff]  ;;  %v180_v37 = vld [vmem:[#allocation7 + $0xf8] sm:$0xff]  ;;  %v179_v42 = vld [vmem:[#allocation7 + $0xf0] sm:$0xff] }
  0x41   :  { %623 = vmatpush1.bf16.msra.mxu1 %v622_v28  ;;  %v626_v39 = vpack.c.bf16 %v184_v36, %v177_v35  ;;  %v640_v41 = vpack.c.bf16 %v187_v38, %v180_v37  ;;  %v186_v43 = vld [vmem:[#allocation7 + $0x128] sm:$0xff]  ;;  %v192_v45 = vld [vmem:[#allocation7 + $0x158] sm:$0xff]  ;;  %v199_v46 = vld [vmem:[#allocation7 + $0x190] sm:$0xff] }
  0x42   :  { %589 = vmatmul.mubr.msk.f32.vlgmr.msra.gmra.mrb[0].mxu0 %vm72_vm1, %v60_v25  ;;  %625 = vmatprep.subr.bf16.mxu1 %v624_v34  ;;  %v642_v44 = vpack.c.bf16 %v186_v43, %v179_v42  ;;  %v194_v47 = vld [vmem:[#allocation7 + $0x168] sm:$0xff]  ;;  %v628_v48 = vpack.c.bf16 %v199_v46, %v192_v45  ;;  %v201_v49 = vld [vmem:[#allocation7 + $0x1a0] sm:$0xff]  ;;  %v191_v50 = vld [vmem:[#allocation7 + $0x150] sm:$0xff] }
  0x43   :  { %635 = vmatpush1.bf16.msra.mxu0 %v634_v27  ;;  %381 = vmatprep.mubr.f32.mxu0 %v804_v1  ;;  %v198_v51 = vld [vmem:[#allocation7 + $0x188] sm:$0xff]  ;;  %v644_v52 = vpack.c.bf16 %v201_v49, %v194_v47  ;;  %v193_v54 = vld [vmem:[#allocation7 + $0x160] sm:$0xff]  ;;  %v200_v55 = vld [vmem:[#allocation7 + $0x198] sm:$0xff] }
  0x44   :  { %637 = vmatprep.subr.bf16.mxu0 %v636_v32  ;;  %v630_v53 = vpack.c.bf16 %v198_v51, %v191_v50  ;;  %v646_v56 = vpack.c.bf16 %v200_v55, %v193_v54  ;;  %v154_v57 = vld [vmem:[#allocation7 + $0x28] sm:$0xff]  ;;  %v161_v58 = vld [vmem:[#allocation7 + $0x60] sm:$0xff]  ;;  %v560_v60 = vld [vmem:[%s909_s2] ss:$0 sm:$0xff] }
  0x45   :  { %627 = vmatpush1.bf16.msra.mxu1 %v626_v39  ;;  %v648_v59 = vpack.c.bf16 %v161_v58, %v154_v57  ;;  %v153_v61 = vld [vmem:[#allocation7 + $0x20] sm:$0xff]  ;;  %v160_v62 = vld [vmem:[#allocation7 + $0x58] sm:$0xff]  ;;  %v155_v2 = vld [vmem:[#allocation7 + $0x30] sm:$0xff] }
  0x46   :  { %629 = vmatprep.subr.bf16.mxu1 %v628_v48  ;;  %v162_v3 = vld [vmem:[#allocation7 + $0x68] sm:$0xff]  ;;  %v168_v6 = vld [vmem:[#allocation7 + $0x98] sm:$0xff]  ;;  %v175_v7 = vld [vmem:[#allocation7 + $0xd0] sm:$0xff]  ;;  %v650_v8 = vpack.c.bf16 %v160_v62, %v153_v61 }
  0x47   :  { %639 = vmatpush1.bf16.msra.mxu0 %v638_v40  ;;  %v665_v10 = vpack.c.bf16 %v162_v3, %v155_v2  ;;  %v167_v11 = vld [vmem:[#allocation7 + $0x90] sm:$0xff]  ;;  %v652_v12 = vpack.c.bf16 %v175_v7, %v168_v6  ;;  %v174_v13 = vld [vmem:[#allocation7 + $0xc8] sm:$0xff]  ;;  %v169_v14 = vld [vmem:[#allocation7 + $0xa0] sm:$0xff] }
  0x48   :  { %641 = vmatprep.subr.bf16.mxu0 %v640_v41  ;;  %v176_v15 = vld [vmem:[#allocation7 + $0xd8] sm:$0xff]  ;;  %v182_v17 = vld [vmem:[#allocation7 + $0x108] sm:$0xff]  ;;  %v189_v18 = vld [vmem:[#allocation7 + $0x140] sm:$0xff]  ;;  %v654_v19 = vpack.c.bf16 %v174_v13, %v167_v11 }
  0x49   :  { %631 = vmatpush1.bf16.msra.mxu1 %v630_v53  ;;  %v668_v20 = vpack.c.bf16 %v176_v15, %v169_v14  ;;  %v181_v21 = vld [vmem:[#allocation7 + $0x100] sm:$0xff]  ;;  %v656_v22 = vpack.c.bf16 %v189_v18, %v182_v17  ;;  %v188_v23 = vld [vmem:[#allocation7 + $0x138] sm:$0xff]  ;;  %v183_v24 = vld [vmem:[#allocation7 + $0x110] sm:$0xff] }
  0x4a   :  { %649 = vmatprep.subr.bf16.mxu1 %v648_v59  ;;  %v190_v25 = vld [vmem:[#allocation7 + $0x148] sm:$0xff]  ;;  %v196_v26 = vld [vmem:[#allocation7 + $0x178] sm:$0xff]  ;;  %v203_v27 = vld [vmem:[#allocation7 + $0x1b0] sm:$0xff]  ;;  %v658_v28 = vpack.c.bf16 %v188_v23, %v181_v21 }
  0x4b   :  { %643 = vmatpush1.bf16.msra.mxu0 %v642_v44  ;;  %v671_v29 = vpack.c.bf16 %v190_v25, %v183_v24  ;;  %v195_v30 = vld [vmem:[#allocation7 + $0x170] sm:$0xff]  ;;  %v660_v31 = vpack.c.bf16 %v203_v27, %v196_v26  ;;  %v202_v32 = vld [vmem:[#allocation7 + $0x1a8] sm:$0xff]  ;;  %v197_v33 = vld [vmem:[#allocation7 + $0x180] sm:$0xff] }
  0x4c   :  { %645 = vmatprep.subr.bf16.mxu0 %v644_v52  ;;  %v204_v34 = vld [vmem:[#allocation7 + $0x1b8] sm:$0xff]  ;;  %v662_v35 = vpack.c.bf16 %v202_v32, %v195_v30 }
  0x4d   :  { %v674_v36 = vpack.c.bf16 %v204_v34, %v197_v33  ;;  %v205_v40 = vld [vmem:[%s911_s4] sm:$0x7f]  ;;  %s805_s4 = smov [#allocation8]  }
  0x4e   :  { %s550_s8 = sshll.u32 %s805_s4, 4  ;;  %s551_s8 = int_to_ptr.vmem [resolvable:$true] %s550_s8 }
  0x4f   :  { %647 = vmatpush1.bf16.msra.mxu0 %v646_v56  ;;  %s767_s9 = scalar_lea.vmem %s551_s8, 896  ;;  %p772_p11 = scmp.lt.s32.totalorder %s551_s8, %s551_s8 }
  0x50   :  { %664 = vmatprep.subr.bf16.mxu0 %v802_v0  ;;  %p768_p10 = scmp.ne.s32.totalorder %s551_s8, %s767_s9  ;;  %p773_p12 = scmp.lt.s32.totalorder %s767_s9, %s767_s9 }
  0x52   :  { %p774_p13 = por %p773_p12, %p772_p11 }
  0x54   :  { %p775_p0 = pnand %p774_p13, %p768_p10 }
 0x115   :  { %v142_v63 = vpop.f32.mrb[0].mxu0 }
 0x116   :  { %v143_v4 = vadd.f32 %v560_v60, %v142_v63  ;;  %v590_v5 = vpop.f32.mrb[1].mxu0 }
 0x118   :  { %vm146_vm2 = vcmp.gt.f32.partialorder %v143_v4, 0.0  ;;  %v147_v9 = vmul.f32 0.2, %v143_v4 }
 0x11a   :  { %v148_v16 = vsel %vm146_vm2, %v143_v4, %v147_v9 }
 0x11b   :  { %562 = vmatmul.mubr.msk.f32.vlgmr.msra.gmra.mrb[0].mxu1 %vm242_vm3, %v148_v16  ;;  %563 = vmatmul.mubr.msk.f32.vlgmr.msra.gmra.mrb[2].mxu0 %vm242_vm3, %v148_v16 }
 0x11c   :  { %651 = vmatpush1.bf16.msra.mxu1 %v650_v8  ;;  %666 = vmatpush3.bf16.msra.mxu0 %v665_v10 }
 0x11d   :  { %653 = vmatprep.subr.bf16.mxu1 %v652_v12  ;;  %667 = vmatprep.subr.bf16.mxu0 %v802_v0 }
 0x11e   :  { %452 = vmatprep.mubr.f32.mxu1 %v804_v1  ;;  %607 = vmatprep.mubr.msk.f32.mxu0 %vm803_vm0, %v804_v1  ;;  %v207_v1 = vlaneseq }
 0x120   :  { %655 = vmatpush1.bf16.msra.mxu1 %v654_v19  ;;  %669 = vmatpush3.bf16.msra.mxu0 %v668_v20  ;;  %v208_v37 = vshrl.u32 %v207_v1, 7 }
 0x121   :  { %657 = vmatprep.subr.bf16.mxu1 %v656_v22  ;;  %670 = vmatprep.subr.bf16.mxu0 %v802_v0 }
 0x122   :  { %v209_v38 = vsub.s32 0, %v208_v37  ;;  %v217_v39 = vsub.s32 2, %v208_v37  ;;  %v213_v41 = vsub.s32 1, %v208_v37  ;;  %v221_v42 = vsub.s32 3, %v208_v37 }
 0x123   :  { %v225_v54 = vsub.s32 4, %v208_v37  ;;  %v233_v55 = vsub.s32 6, %v208_v37  ;;  %v229_v56 = vsub.s32 5, %v208_v37 }
 0x124   :  { %659 = vmatpush1.bf16.msra.mxu1 %v658_v28  ;;  %672 = vmatpush3.bf16.msra.mxu0 %v671_v29  ;;  %v210_v43 = vrot.slane %v205_v40, %v209_v38  ;;  %v218_v44 = vrot.slane %v205_v40, %v217_v39  ;;  %v214_v45 = vrot.slane %v205_v40, %v213_v41 }
 0x125   :  { %661 = vmatprep.subr.bf16.mxu1 %v660_v31  ;;  %673 = vmatprep.subr.bf16.mxu0 %v802_v0  ;;  %v222_v0 = vrot.slane %v205_v40, %v221_v42  ;;  %v226_v58 = vrot.slane %v205_v40, %v225_v54  ;;  %v234_v59 = vrot.slane %v205_v40, %v233_v55 }
 0x126   :  { %v230_v61 = vrot.slane %v205_v40, %v229_v56 }
 0x128   :  { %663 = vmatpush1.bf16.msra.mxu1 %v662_v35  ;;  %675 = vmatpush3.bf16.msra.mxu0 %v674_v36 }
 0x12b   :  { %564 = vmatmul.mubr.msk.f32.vlgmr.msra.gmra.mrb[2].mxu1 %vm242_vm3, %v148_v16  ;;  %608 = vmatmul.mubr.msk.f32.vlgmr.msra.gmra.mrb[4].mxu0 %vm242_vm3, %v148_v16 }
 0x1ee   :  { %v312_v46 = vpop.f32.mrb[0].mxu1  ;;  %v383_v47 = vpop.f32.mrb[2].mxu0 }
 0x1ef   :  { %v313_v48 = vadd.f32 %v312_v46, %v210_v43  ;;  %v384_v49 = vadd.f32 %v383_v47, %v218_v44  ;;  %v314_v50 = vpop.f32.mrb[1].mxu1  ;;  %v385_v51 = vpop.f32.mrb[3].mxu0 }
 0x1f0   :  { %v315_v52 = vadd.f32 %v314_v50, %v214_v45  ;;  %v386_v53 = vadd.f32 %v385_v51, %v222_v0 }
 0x1f1   :  { %687 = vtanh.f32 %v313_v48 }
 0x1f2   :  { %689 = vtanh.f32 %v384_v49 }
 0x1f3   :  { %691 = vtanh.f32 %v315_v52 }
 0x1f4   :  { %693 = vtanh.f32 %v386_v53 }
 0x1fb   :  { %v688_v57 = vpop.eup %687 }
 0x1fc   :  { %v690_v60 = vpop.eup %689  ;;  %536 = vst [vmem:[#allocation8] sm:$0xff] %v688_v57 }
 0x1fd   :  { %v692_v62 = vpop.eup %691  ;;  %538 = vst [vmem:[#allocation8 + $0x10] sm:$0xff] %v690_v60 }
 0x1fe   :  { %v694_v63 = vpop.eup %693  ;;  %537 = vst [vmem:[#allocation8 + $0x8] sm:$0xff] %v692_v62  ;;  %v454_v2 = vpop.f32.mrb[2].mxu1 }
 0x1ff   :  { %v525_v3 = vpop.f32.mrb[4].mxu0  ;;  %539 = vst [vmem:[#allocation8 + $0x18] sm:$0xff] %v694_v63  ;;  %v455_v4 = vadd.f32 %v454_v2, %v226_v58  ;;  %v456_v6 = vpop.f32.mrb[3].mxu1 }
 0x200   :  { %v526_v5 = vadd.f32 %v525_v3, %v234_v59  ;;  %v609_v7 = vpop.f32.mrb[5].mxu0  ;;  %v457_v8 = vadd.f32 %v456_v6, %v230_v61 }
 0x201   :  { %695 = vtanh.f32 %v455_v4 }
 0x202   :  { %697 = vtanh.f32 %v526_v5 }
 0x203   :  { %699 = vtanh.f32 %v457_v8 }
 0x20b   :  { %v696_v9 = vpop.eup %695 }
 0x20c   :  { %v698_v10 = vpop.eup %697  ;;  %540 = vst [vmem:[#allocation8 + $0x20] sm:$0xff] %v696_v9 }
 0x20d   :  { %v700_v11 = vpop.eup %699  ;;  %543 = vst.msk [vmem:[#allocation8 + $0x30] sm:$0xff] %vm542_vm4, %v698_v10 }
 0x20e   :  { %541 = vst [vmem:[#allocation8 + $0x28] sm:$0xff] %v700_v11 }
 0x20f   :  { %778 = shalt.err (!%p775_p0)
}
 0x210   :  { %s779_s12 = scalar_lea.hbm %s912_s5, 896 }
 0x211   :  { %p780_p1 = scmp.ne.s32.totalorder %s912_s5, %s779_s12  ;;  %p783_p2 = scmp.lt.u32.totalorder %s779_s12, %s912_s5 }
 0x213   :  { %p785_p3 = pnand %p783_p2, %p780_p1 }
 0x215   :  { %788 = shalt.err (!%p785_p3)
}
 0x216   :  { %553 = dma.vmem_to_hbm [thread:$0]  %s551_s8, 896, %s912_s5, [#allocation4]  }
 0x217   :  { %793 = dma.done.wait [#allocation4], 896  }
 0x218   :  { %794 = vsyncadd [#allocation4], 4294966400 }
 0x219   :  { %557 = vsyncpa [#allocation3], 1 }
 0x21a   :  { %558 = vsyncpa [#allocation6], 1 }
 0x21b   :  { %559 = vsyncpa [#allocation4], 1 }

</bundles_post_ra>
